<compile_context>
chip_gen: v7x
topology: tpu7x:2x2x1
jax: 0.10.0
libtpu: 0.0.40
codegen_flags: <defaults>
</compile_context>

<pallas_src>
import functools
import math

import jax
import jax.numpy as jnp
from jax.experimental import pallas as pl
from jax.experimental.pallas import tpu as pltpu


_LOG_DET_EPS = 1e-8
_HALF_LOG_2PI = 0.5 * math.log(2.0 * math.pi)


def _flow_kernel(z0t_ref, w_ref, b_ref, gt_ref, ut_ref, wu_ref,
                 zt_ref, lp_ref, lin_ref, h_ref, *, num_transforms, dim):
    K = num_transforms
    z0t = z0t_ref[...]                                         # (D, TB) f32

    # lin^T[k, :] = w_k . z0 + b_k   -- one small MXU matmul, batch on lanes.
    lin_ref[...] = (jnp.dot(w_ref[...], z0t,
                            preferred_element_type=jnp.float32)
                    + b_ref[...])                              # (K, TB)

    # Serial planar-flow recurrence on dense (K, TB) sublane rows:
    #   h_k    = tanh(lin_k)
    #   lin_j += h_k * (u_k . w_j)   for all j (columns j <= k are dead;
    #   skipping them would need sublane-unaligned slices -> not worth it).
    for k in range(K):                                         # static unroll
        h_row = jnp.tanh(lin_ref[k:k + 1, :])                  # (1, TB)  EUP
        h_ref[k:k + 1, :] = h_row                              # direct row write
        if k + 1 < K:
            # (K,1) x (1,TB) outer-product FMA on ~4 dense vregs.
            lin_ref[...] = lin_ref[...] + gt_ref[:, k:k + 1] * h_row

    H = h_ref[...]                                             # (K, TB)

    # z^T = z0^T + U^T @ H   (MXU)
    zt = z0t + jnp.dot(ut_ref[...], H, preferred_element_type=jnp.float32)

    # log-det over all K transforms at once (dense (K, TB) vregs).
    terms = 1.0 + (1.0 - H * H) * wu_ref[...]                  # (K, TB)
    log_det = jnp.sum(jnp.log(jnp.abs(terms) + _LOG_DET_EPS),
                      axis=0, keepdims=True)                   # (1, TB)

    # Standard-Normal log_prob(z_K) + log_det (same convention as reference).
    lp_base = (-0.5 * jnp.sum(zt * zt, axis=0, keepdims=True)
               - dim * _HALF_LOG_2PI)                          # (1, TB)

    zt_ref[...] = zt                                           # (D, TB) lane-dense
    lp_ref[...] = lp_base + log_det                            # (1, TB) lane-dense vst


def _round_up(n, m):
    return ((n + m - 1) // m) * m


def normalizing_flow_forward(x, params, sample_key, *, block_b=512):
    """Mirrors NormalizingFlow.forward: returns (z, log_prob).

    block_b: lanes (batch elements) per grid step. Default 512 keeps the grid
    at 1-2 steps on single-TC v5e/v6e; use 256 on v7x so each of the two
    TensorCores gets >=2 steps. VMEM is a non-issue at these sizes.
    """
    u, w, b = params
    K, D = u.shape
    B = x.shape[0]

    # base_dist.sample(x.shape[0]) -- drawn directly in the transposed (D, B)
    # layout so the batch sits on the lane axis (no wrapper transpose of z0).
    # TODO(synk): could move in-kernel via pltpu.prng_* + stateful_normal if
    # bit-exact host-RNG parity is not required (saves one HBM round trip).
    z0t = jax.random.normal(sample_key, (D, B), dtype=jnp.float32)

    # Batch-independent precomputes, hoisted out of the kernel (tiny).
    gt = w @ u.T                               # (K, K): gt[j, k] = u_k . w_j
    ut = u.T                                   # (D, K)
    wu = jnp.sum(u * w, axis=1)[:, None]       # (K, 1): w_k . u_k
    b_col = b.reshape(K, 1)                    # (K, 1)

    # Batch tiling: TB lanes per grid step (multiple of 128 -> dense vregs,
    # unmasked full-width stores); pad B on the lane axis if needed.
    TB = min(B, block_b)
    TB = _round_up(TB, 128)
    B_pad = _round_up(B, TB)
    if B_pad != B:
        z0t = jnp.pad(z0t, ((0, 0), (0, B_pad - B)))
    grid = (B_pad // TB,)

    kernel = functools.partial(_flow_kernel, num_transforms=K, dim=D)
    rep = lambda shape: pl.BlockSpec(shape, lambda i: (0, 0))   # replicated param

    zt, lp = pl.pallas_call(
        kernel,
        out_shape=(jax.ShapeDtypeStruct((D, B_pad), jnp.float32),
                   jax.ShapeDtypeStruct((1, B_pad), jnp.float32)),
        grid=grid,
        in_specs=[pl.BlockSpec((D, TB), lambda i: (0, i)),   # z0^T
                  rep((K, D)),      # W
                  rep((K, 1)),      # b
                  rep((K, K)),      # G^T  (gt[j, k] = u_k . w_j)
                  rep((D, K)),      # U^T
                  rep((K, 1))],     # w_k . u_k
        out_specs=(pl.BlockSpec((D, TB), lambda i: (0, i)),
                   pl.BlockSpec((1, TB), lambda i: (0, i))),
        scratch_shapes=[pltpu.VMEM((K, TB), jnp.float32),    # lin^T
                        pltpu.VMEM((K, TB), jnp.float32)],   # H^T
        compiler_params=pltpu.CompilerParams(
            dimension_semantics=("parallel",)),
    )(z0t, w, b_col, gt, ut, wu)

    # Un-transpose outside the kernel (tiny XLA transpose) and drop padding.
    return zt[:, :B].T, lp[0, :B]


def _reference_forward(x, params, sample_key):
    """Pure-JAX reference (naive sequential chain), for correctness check."""
    u, w, b = params
    K, D = u.shape
    B = x.shape[0]
    # Same RNG draw layout as the kernel wrapper ((D, B)) for exact parity.
    z = jax.random.normal(sample_key, (D, B), dtype=jnp.float32).T
    log_det = jnp.zeros((B,), jnp.float32)
    for k in range(K):
        lin = z @ w[k] + b[k, 0]
        h = jnp.tanh(lin)
        z = z + h[:, None] * u[k][None, :]
        hprime = 1.0 - h * h
        wu = jnp.sum(w[k] * u[k])
        log_det = log_det + jnp.log(jnp.abs(1.0 + hprime * wu) + _LOG_DET_EPS)
    lp = (-0.5 * jnp.sum(z * z, axis=1)
          - 0.5 * D * math.log(2.0 * math.pi)) + log_det
    return z, lp


if __name__ == "__main__":
    key = jax.random.PRNGKey(0)
    kx, kz, ku, kw = jax.random.split(key, 4)

    B, D, K = 640, 32, 8                  # batch, feature dim, num transforms
    x = jax.random.normal(kx, (B, D), dtype=jnp.float32)  # only shape[0] used

    # Deterministic parameter init for the K planar flows.
    u = 0.1 * jax.random.normal(ku, (K, D), dtype=jnp.float32)
    w = 0.1 * jax.random.normal(kw, (K, D), dtype=jnp.float32)
    b = jnp.zeros((K, 1), jnp.float32)
    params = (u, w, b)

    # block_b=256 exercises a multi-step grid (and is the v7x-friendly choice).
    z, log_prob = normalizing_flow_forward(x, params, kz, block_b=256)
    jax.block_until_ready((z, log_prob))

    z_ref, lp_ref = _reference_forward(x, params, kz)
    assert z.shape == (B, D) and log_prob.shape == (B,)
    assert jnp.allclose(z, z_ref, atol=1e-4, rtol=1e-4)
    assert jnp.allclose(log_prob, lp_ref, atol=1e-4, rtol=1e-4)

    print("KERNEL_OK")
</pallas_src>

<mosaic_0001>
module attributes {stable_mosaic.version = 11 : i64} {
  func.func @_flow_kernel(%arg0: i32, %arg1: memref<32x256xf32, #tpu.memory_space<vmem>>, %arg2: memref<8x32xf32, #tpu.memory_space<vmem>>, %arg3: memref<8x1xf32, #tpu.memory_space<vmem>>, %arg4: memref<8x8xf32, #tpu.memory_space<vmem>>, %arg5: memref<32x8xf32, #tpu.memory_space<vmem>>, %arg6: memref<8x1xf32, #tpu.memory_space<vmem>>, %arg7: memref<32x256xf32, #tpu.memory_space<vmem>>, %arg8: memref<1x256xf32, #tpu.memory_space<vmem>>, %arg9: memref<8x256xf32, #tpu.memory_space<vmem>>, %arg10: memref<8x256xf32, #tpu.memory_space<vmem>>) attributes {dimension_semantics = [#tpu.dimension_semantics<parallel>], iteration_bounds = array<i64: 3>, scalar_prefetch = 0 : i64, scratch_operands = 2 : i64, tpu.core_type = #tpu.core_type<tc>, window_params = [{transform_indices = @transform_0, window_bounds = array<i64: 32, 256>}, {pipeline_mode = #tpu.pipeline_mode<synchronous>, transform_indices = @transform_1, window_bounds = array<i64: 8, 32>}, {pipeline_mode = #tpu.pipeline_mode<synchronous>, transform_indices = @transform_2, window_bounds = array<i64: 8, 1>}, {pipeline_mode = #tpu.pipeline_mode<synchronous>, transform_indices = @transform_3, window_bounds = array<i64: 8, 8>}, {pipeline_mode = #tpu.pipeline_mode<synchronous>, transform_indices = @transform_4, window_bounds = array<i64: 32, 8>}, {pipeline_mode = #tpu.pipeline_mode<synchronous>, transform_indices = @transform_5, window_bounds = array<i64: 8, 1>}, {transform_indices = @transform_6, window_bounds = array<i64: 32, 256>}, {transform_indices = @transform_7, window_bounds = array<i64: 1, 256>}]} {
    %c0 = arith.constant 0 : index
    %c0_0 = arith.constant 0 : index
    %0 = vector.load %arg1[%c0, %c0_0] : memref<32x256xf32, #tpu.memory_space<vmem>>, vector<32x256xf32>
    %c0_1 = arith.constant 0 : index
    %c0_2 = arith.constant 0 : index
    %1 = vector.load %arg2[%c0_1, %c0_2] : memref<8x32xf32, #tpu.memory_space<vmem>>, vector<8x32xf32>
    %cst = arith.constant dense<0.000000e+00> : vector<8x256xf32>
    %2 = tpu.matmul %1, %0, %cst {dimension_numbers = #tpu.dot_dimension_numbers<[1], [0], [0], [1], [0, 0, 1, 1], [], []>} : vector<8x32xf32>, vector<32x256xf32>, vector<8x256xf32> -> vector<8x256xf32>
    %c0_3 = arith.constant 0 : index
    %c0_4 = arith.constant 0 : index
    %3 = vector.load %arg3[%c0_3, %c0_4] : memref<8x1xf32, #tpu.memory_space<vmem>>, vector<8x1xf32>
    %4 = vector.broadcast %3 : vector<8x1xf32> to vector<8x256xf32>
    %5 = arith.addf %2, %4 : vector<8x256xf32>
    %c0_5 = arith.constant 0 : index
    %c0_6 = arith.constant 0 : index
    %6 = vector.load %arg9[%c0_5, %c0_6] : memref<8x256xf32, #tpu.memory_space<vmem>>, vector<8x256xf32>
    tpu.vector_store %arg9[%c0_5, %c0_6], %5 {strides = array<i32>} : memref<8x256xf32, #tpu.memory_space<vmem>>, vector<8x256xf32>,
    %c0_7 = arith.constant 0 : index
    %c0_8 = arith.constant 0 : index
    %7 = vector.load %arg9[%c0_7, %c0_8] : memref<8x256xf32, #tpu.memory_space<vmem>>, vector<1x256xf32>
    %8 = math.tanh %7 : vector<1x256xf32>
    %c0_9 = arith.constant 0 : index
    %c0_10 = arith.constant 0 : index
    %9 = vector.load %arg10[%c0_9, %c0_10] : memref<8x256xf32, #tpu.memory_space<vmem>>, vector<1x256xf32>
    tpu.vector_store %arg10[%c0_9, %c0_10], %8 {strides = array<i32>} : memref<8x256xf32, #tpu.memory_space<vmem>>, vector<1x256xf32>,
    %c0_11 = arith.constant 0 : index
    %c0_12 = arith.constant 0 : index
    %10 = vector.load %arg9[%c0_11, %c0_12] : memref<8x256xf32, #tpu.memory_space<vmem>>, vector<8x256xf32>
    %c0_13 = arith.constant 0 : index
    %c0_14 = arith.constant 0 : index
    %11 = vector.load %arg4[%c0_13, %c0_14] : memref<8x8xf32, #tpu.memory_space<vmem>>, vector<8x1xf32>
    %12 = vector.broadcast %11 : vector<8x1xf32> to vector<8x256xf32>
    %13 = vector.broadcast %8 : vector<1x256xf32> to vector<8x256xf32>
    %14 = arith.mulf %12, %13 : vector<8x256xf32>
    %15 = arith.addf %10, %14 : vector<8x256xf32>
    %c0_15 = arith.constant 0 : index
    %c0_16 = arith.constant 0 : index
    %16 = vector.load %arg9[%c0_15, %c0_16] : memref<8x256xf32, #tpu.memory_space<vmem>>, vector<8x256xf32>
    tpu.vector_store %arg9[%c0_15, %c0_16], %15 {strides = array<i32>} : memref<8x256xf32, #tpu.memory_space<vmem>>, vector<8x256xf32>,
    %c1 = arith.constant 1 : index
    %c0_17 = arith.constant 0 : index
    %17 = vector.load %arg9[%c1, %c0_17] : memref<8x256xf32, #tpu.memory_space<vmem>>, vector<1x256xf32>
    %18 = math.tanh %17 : vector<1x256xf32>
    %c1_18 = arith.constant 1 : index
    %c0_19 = arith.constant 0 : index
    %19 = vector.load %arg10[%c1_18, %c0_19] : memref<8x256xf32, #tpu.memory_space<vmem>>, vector<1x256xf32>
    tpu.vector_store %arg10[%c1_18, %c0_19], %18 {strides = array<i32>} : memref<8x256xf32, #tpu.memory_space<vmem>>, vector<1x256xf32>,
    %c0_20 = arith.constant 0 : index
    %c0_21 = arith.constant 0 : index
    %20 = vector.load %arg9[%c0_20, %c0_21] : memref<8x256xf32, #tpu.memory_space<vmem>>, vector<8x256xf32>
    %c0_22 = arith.constant 0 : index
    %c1_23 = arith.constant 1 : index
    %21 = vector.load %arg4[%c0_22, %c1_23] : memref<8x8xf32, #tpu.memory_space<vmem>>, vector<8x1xf32>
    %22 = vector.broadcast %21 : vector<8x1xf32> to vector<8x256xf32>
    %23 = vector.broadcast %18 : vector<1x256xf32> to vector<8x256xf32>
    %24 = arith.mulf %22, %23 : vector<8x256xf32>
    %25 = arith.addf %20, %24 : vector<8x256xf32>
    %c0_24 = arith.constant 0 : index
    %c0_25 = arith.constant 0 : index
    %26 = vector.load %arg9[%c0_24, %c0_25] : memref<8x256xf32, #tpu.memory_space<vmem>>, vector<8x256xf32>
    tpu.vector_store %arg9[%c0_24, %c0_25], %25 {strides = array<i32>} : memref<8x256xf32, #tpu.memory_space<vmem>>, vector<8x256xf32>,
    %c2 = arith.constant 2 : index
    %c0_26 = arith.constant 0 : index
    %27 = vector.load %arg9[%c2, %c0_26] : memref<8x256xf32, #tpu.memory_space<vmem>>, vector<1x256xf32>
    %28 = math.tanh %27 : vector<1x256xf32>
    %c2_27 = arith.constant 2 : index
    %c0_28 = arith.constant 0 : index
    %29 = vector.load %arg10[%c2_27, %c0_28] : memref<8x256xf32, #tpu.memory_space<vmem>>, vector<1x256xf32>
    tpu.vector_store %arg10[%c2_27, %c0_28], %28 {strides = array<i32>} : memref<8x256xf32, #tpu.memory_space<vmem>>, vector<1x256xf32>,
    %c0_29 = arith.constant 0 : index
    %c0_30 = arith.constant 0 : index
    %30 = vector.load %arg9[%c0_29, %c0_30] : memref<8x256xf32, #tpu.memory_space<vmem>>, vector<8x256xf32>
    %c0_31 = arith.constant 0 : index
    %c2_32 = arith.constant 2 : index
    %31 = vector.load %arg4[%c0_31, %c2_32] : memref<8x8xf32, #tpu.memory_space<vmem>>, vector<8x1xf32>
    %32 = vector.broadcast %31 : vector<8x1xf32> to vector<8x256xf32>
    %33 = vector.broadcast %28 : vector<1x256xf32> to vector<8x256xf32>
    %34 = arith.mulf %32, %33 : vector<8x256xf32>
    %35 = arith.addf %30, %34 : vector<8x256xf32>
    %c0_33 = arith.constant 0 : index
    %c0_34 = arith.constant 0 : index
    %36 = vector.load %arg9[%c0_33, %c0_34] : memref<8x256xf32, #tpu.memory_space<vmem>>, vector<8x256xf32>
    tpu.vector_store %arg9[%c0_33, %c0_34], %35 {strides = array<i32>} : memref<8x256xf32, #tpu.memory_space<vmem>>, vector<8x256xf32>,
    %c3 = arith.constant 3 : index
    %c0_35 = arith.constant 0 : index
    %37 = vector.load %arg9[%c3, %c0_35] : memref<8x256xf32, #tpu.memory_space<vmem>>, vector<1x256xf32>
    %38 = math.tanh %37 : vector<1x256xf32>
    %c3_36 = arith.constant 3 : index
    %c0_37 = arith.constant 0 : index
    %39 = vector.load %arg10[%c3_36, %c0_37] : memref<8x256xf32, #tpu.memory_space<vmem>>, vector<1x256xf32>
    tpu.vector_store %arg10[%c3_36, %c0_37], %38 {strides = array<i32>} : memref<8x256xf32, #tpu.memory_space<vmem>>, vector<1x256xf32>,
    %c0_38 = arith.constant 0 : index
    %c0_39 = arith.constant 0 : index
    %40 = vector.load %arg9[%c0_38, %c0_39] : memref<8x256xf32, #tpu.memory_space<vmem>>, vector<8x256xf32>
    %c0_40 = arith.constant 0 : index
    %c3_41 = arith.constant 3 : index
    %41 = vector.load %arg4[%c0_40, %c3_41] : memref<8x8xf32, #tpu.memory_space<vmem>>, vector<8x1xf32>
    %42 = vector.broadcast %41 : vector<8x1xf32> to vector<8x256xf32>
    %43 = vector.broadcast %38 : vector<1x256xf32> to vector<8x256xf32>
    %44 = arith.mulf %42, %43 : vector<8x256xf32>
    %45 = arith.addf %40, %44 : vector<8x256xf32>
    %c0_42 = arith.constant 0 : index
    %c0_43 = arith.constant 0 : index
    %46 = vector.load %arg9[%c0_42, %c0_43] : memref<8x256xf32, #tpu.memory_space<vmem>>, vector<8x256xf32>
    tpu.vector_store %arg9[%c0_42, %c0_43], %45 {strides = array<i32>} : memref<8x256xf32, #tpu.memory_space<vmem>>, vector<8x256xf32>,
    %c4 = arith.constant 4 : index
    %c0_44 = arith.constant 0 : index
    %47 = vector.load %arg9[%c4, %c0_44] : memref<8x256xf32, #tpu.memory_space<vmem>>, vector<1x256xf32>
    %48 = math.tanh %47 : vector<1x256xf32>
    %c4_45 = arith.constant 4 : index
    %c0_46 = arith.constant 0 : index
    %49 = vector.load %arg10[%c4_45, %c0_46] : memref<8x256xf32, #tpu.memory_space<vmem>>, vector<1x256xf32>
    tpu.vector_store %arg10[%c4_45, %c0_46], %48 {strides = array<i32>} : memref<8x256xf32, #tpu.memory_space<vmem>>, vector<1x256xf32>,
    %c0_47 = arith.constant 0 : index
    %c0_48 = arith.constant 0 : index
    %50 = vector.load %arg9[%c0_47, %c0_48] : memref<8x256xf32, #tpu.memory_space<vmem>>, vector<8x256xf32>
    %c0_49 = arith.constant 0 : index
    %c4_50 = arith.constant 4 : index
    %51 = vector.load %arg4[%c0_49, %c4_50] : memref<8x8xf32, #tpu.memory_space<vmem>>, vector<8x1xf32>
    %52 = vector.broadcast %51 : vector<8x1xf32> to vector<8x256xf32>
    %53 = vector.broadcast %48 : vector<1x256xf32> to vector<8x256xf32>
    %54 = arith.mulf %52, %53 : vector<8x256xf32>
    %55 = arith.addf %50, %54 : vector<8x256xf32>
    %c0_51 = arith.constant 0 : index
    %c0_52 = arith.constant 0 : index
    %56 = vector.load %arg9[%c0_51, %c0_52] : memref<8x256xf32, #tpu.memory_space<vmem>>, vector<8x256xf32>
    tpu.vector_store %arg9[%c0_51, %c0_52], %55 {strides = array<i32>} : memref<8x256xf32, #tpu.memory_space<vmem>>, vector<8x256xf32>,
    %c5 = arith.constant 5 : index
    %c0_53 = arith.constant 0 : index
    %57 = vector.load %arg9[%c5, %c0_53] : memref<8x256xf32, #tpu.memory_space<vmem>>, vector<1x256xf32>
    %58 = math.tanh %57 : vector<1x256xf32>
    %c5_54 = arith.constant 5 : index
    %c0_55 = arith.constant 0 : index
    %59 = vector.load %arg10[%c5_54, %c0_55] : memref<8x256xf32, #tpu.memory_space<vmem>>, vector<1x256xf32>
    tpu.vector_store %arg10[%c5_54, %c0_55], %58 {strides = array<i32>} : memref<8x256xf32, #tpu.memory_space<vmem>>, vector<1x256xf32>,
    %c0_56 = arith.constant 0 : index
    %c0_57 = arith.constant 0 : index
    %60 = vector.load %arg9[%c0_56, %c0_57] : memref<8x256xf32, #tpu.memory_space<vmem>>, vector<8x256xf32>
    %c0_58 = arith.constant 0 : index
    %c5_59 = arith.constant 5 : index
    %61 = vector.load %arg4[%c0_58, %c5_59] : memref<8x8xf32, #tpu.memory_space<vmem>>, vector<8x1xf32>
    %62 = vector.broadcast %61 : vector<8x1xf32> to vector<8x256xf32>
    %63 = vector.broadcast %58 : vector<1x256xf32> to vector<8x256xf32>
    %64 = arith.mulf %62, %63 : vector<8x256xf32>
    %65 = arith.addf %60, %64 : vector<8x256xf32>
    %c0_60 = arith.constant 0 : index
    %c0_61 = arith.constant 0 : index
    %66 = vector.load %arg9[%c0_60, %c0_61] : memref<8x256xf32, #tpu.memory_space<vmem>>, vector<8x256xf32>
    tpu.vector_store %arg9[%c0_60, %c0_61], %65 {strides = array<i32>} : memref<8x256xf32, #tpu.memory_space<vmem>>, vector<8x256xf32>,
    %c6 = arith.constant 6 : index
    %c0_62 = arith.constant 0 : index
    %67 = vector.load %arg9[%c6, %c0_62] : memref<8x256xf32, #tpu.memory_space<vmem>>, vector<1x256xf32>
    %68 = math.tanh %67 : vector<1x256xf32>
    %c6_63 = arith.constant 6 : index
    %c0_64 = arith.constant 0 : index
    %69 = vector.load %arg10[%c6_63, %c0_64] : memref<8x256xf32, #tpu.memory_space<vmem>>, vector<1x256xf32>
    tpu.vector_store %arg10[%c6_63, %c0_64], %68 {strides = array<i32>} : memref<8x256xf32, #tpu.memory_space<vmem>>, vector<1x256xf32>,
    %c0_65 = arith.constant 0 : index
    %c0_66 = arith.constant 0 : index
    %70 = vector.load %arg9[%c0_65, %c0_66] : memref<8x256xf32, #tpu.memory_space<vmem>>, vector<8x256xf32>
    %c0_67 = arith.constant 0 : index
    %c6_68 = arith.constant 6 : index
    %71 = vector.load %arg4[%c0_67, %c6_68] : memref<8x8xf32, #tpu.memory_space<vmem>>, vector<8x1xf32>
    %72 = vector.broadcast %71 : vector<8x1xf32> to vector<8x256xf32>
    %73 = vector.broadcast %68 : vector<1x256xf32> to vector<8x256xf32>
    %74 = arith.mulf %72, %73 : vector<8x256xf32>
    %75 = arith.addf %70, %74 : vector<8x256xf32>
    %c0_69 = arith.constant 0 : index
    %c0_70 = arith.constant 0 : index
    %76 = vector.load %arg9[%c0_69, %c0_70] : memref<8x256xf32, #tpu.memory_space<vmem>>, vector<8x256xf32>
    tpu.vector_store %arg9[%c0_69, %c0_70], %75 {strides = array<i32>} : memref<8x256xf32, #tpu.memory_space<vmem>>, vector<8x256xf32>,
    %c7 = arith.constant 7 : index
    %c0_71 = arith.constant 0 : index
    %77 = vector.load %arg9[%c7, %c0_71] : memref<8x256xf32, #tpu.memory_space<vmem>>, vector<1x256xf32>
    %78 = math.tanh %77 : vector<1x256xf32>
    %c7_72 = arith.constant 7 : index
    %c0_73 = arith.constant 0 : index
    %79 = vector.load %arg10[%c7_72, %c0_73] : memref<8x256xf32, #tpu.memory_space<vmem>>, vector<1x256xf32>
    tpu.vector_store %arg10[%c7_72, %c0_73], %78 {strides = array<i32>} : memref<8x256xf32, #tpu.memory_space<vmem>>, vector<1x256xf32>,
    %c0_74 = arith.constant 0 : index
    %c0_75 = arith.constant 0 : index
    %80 = vector.load %arg10[%c0_74, %c0_75] : memref<8x256xf32, #tpu.memory_space<vmem>>, vector<8x256xf32>
    %c0_76 = arith.constant 0 : index
    %c0_77 = arith.constant 0 : index
    %81 = vector.load %arg5[%c0_76, %c0_77] : memref<32x8xf32, #tpu.memory_space<vmem>>, vector<32x8xf32>
    %cst_78 = arith.constant dense<0.000000e+00> : vector<32x256xf32>
    %82 = tpu.matmul %81, %80, %cst_78 {dimension_numbers = #tpu.dot_dimension_numbers<[1], [0], [0], [1], [0, 0, 1, 1], [], []>} : vector<32x8xf32>, vector<8x256xf32>, vector<32x256xf32> -> vector<32x256xf32>
    %83 = arith.addf %0, %82 : vector<32x256xf32>
    %84 = arith.mulf %80, %80 : vector<8x256xf32>
    %cst_79 = arith.constant 1.000000e+00 : f32
    %85 = vector.broadcast %cst_79 : f32 to vector<8x256xf32>
    %86 = arith.subf %85, %84 : vector<8x256xf32>
    %c0_80 = arith.constant 0 : index
    %c0_81 = arith.constant 0 : index
    %87 = vector.load %arg6[%c0_80, %c0_81] : memref<8x1xf32, #tpu.memory_space<vmem>>, vector<8x1xf32>
    %88 = vector.broadcast %87 : vector<8x1xf32> to vector<8x256xf32>
    %89 = arith.mulf %86, %88 : vector<8x256xf32>
    %cst_82 = arith.constant 1.000000e+00 : f32
    %90 = vector.broadcast %cst_82 : f32 to vector<8x256xf32>
    %91 = arith.addf %90, %89 : vector<8x256xf32>
    %92 = math.absf %91 : vector<8x256xf32>
    %cst_83 = arith.constant 9.99999993E-9 : f32
    %93 = vector.broadcast %cst_83 : f32 to vector<8x256xf32>
    %94 = arith.addf %92, %93 : vector<8x256xf32>
    %95 = math.log %94 : vector<8x256xf32>
    %cst_84 = arith.constant dense<0.000000e+00> : vector<256xf32>
    %96 = vector.multi_reduction <add>, %95, %cst_84 [0] : vector<8x256xf32> to vector<256xf32>
    %97 = vector.shape_cast %96 : vector<256xf32> to vector<1x256xf32>
    %98 = arith.mulf %83, %83 : vector<32x256xf32>
    %cst_85 = arith.constant dense<0.000000e+00> : vector<256xf32>
    %99 = vector.multi_reduction <add>, %98, %cst_85 [0] : vector<32x256xf32> to vector<256xf32>
    %100 = vector.shape_cast %99 : vector<256xf32> to vector<1x256xf32>
    %cst_86 = arith.constant -5.000000e-01 : f32
    %101 = vector.broadcast %cst_86 : f32 to vector<1x256xf32>
    %102 = arith.mulf %101, %100 : vector<1x256xf32>
    %cst_87 = arith.constant 29.4060326 : f32
    %103 = vector.broadcast %cst_87 : f32 to vector<1x256xf32>
    %104 = arith.subf %102, %103 : vector<1x256xf32>
    %c0_88 = arith.constant 0 : index
    %c0_89 = arith.constant 0 : index
    %105 = vector.load %arg7[%c0_88, %c0_89] : memref<32x256xf32, #tpu.memory_space<vmem>>, vector<32x256xf32>
    tpu.vector_store %arg7[%c0_88, %c0_89], %83 {strides = array<i32>} : memref<32x256xf32, #tpu.memory_space<vmem>>, vector<32x256xf32>,
    %106 = arith.addf %104, %97 : vector<1x256xf32>
    %c0_90 = arith.constant 0 : index
    %c0_91 = arith.constant 0 : index
    %107 = vector.load %arg8[%c0_90, %c0_91] : memref<1x256xf32, #tpu.memory_space<vmem>>, vector<1x256xf32>
    tpu.vector_store %arg8[%c0_90, %c0_91], %106 {strides = array<i32>} : memref<1x256xf32, #tpu.memory_space<vmem>>, vector<1x256xf32>,
    return
  }
  func.func @transform_0(%arg0: i32) -> (i32, i32) {
    %c0_i32 = arith.constant 0 : i32
    %c0_i32_0 = arith.constant 0 : i32
    return %c0_i32, %arg0 : i32, i32
  }
  func.func @transform_1(%arg0: i32) -> (i32, i32) {
    %c0_i32 = arith.constant 0 : i32
    %c0_i32_0 = arith.constant 0 : i32
    %c0_i32_1 = arith.constant 0 : i32
    return %c0_i32, %c0_i32_0 : i32, i32
  }
  func.func @transform_2(%arg0: i32) -> (i32, i32) {
    %c0_i32 = arith.constant 0 : i32
    %c0_i32_0 = arith.constant 0 : i32
    %c0_i32_1 = arith.constant 0 : i32
    return %c0_i32, %c0_i32_0 : i32, i32
  }
  func.func @transform_3(%arg0: i32) -> (i32, i32) {
    %c0_i32 = arith.constant 0 : i32
    %c0_i32_0 = arith.constant 0 : i32
    %c0_i32_1 = arith.constant 0 : i32
    return %c0_i32, %c0_i32_0 : i32, i32
  }
  func.func @transform_4(%arg0: i32) -> (i32, i32) {
    %c0_i32 = arith.constant 0 : i32
    %c0_i32_0 = arith.constant 0 : i32
    %c0_i32_1 = arith.constant 0 : i32
    return %c0_i32, %c0_i32_0 : i32, i32
  }
  func.func @transform_5(%arg0: i32) -> (i32, i32) {
    %c0_i32 = arith.constant 0 : i32
    %c0_i32_0 = arith.constant 0 : i32
    %c0_i32_1 = arith.constant 0 : i32
    return %c0_i32, %c0_i32_0 : i32, i32
  }
  func.func @transform_6(%arg0: i32) -> (i32, i32) {
    %c0_i32 = arith.constant 0 : i32
    %c0_i32_0 = arith.constant 0 : i32
    return %c0_i32, %arg0 : i32, i32
  }
  func.func @transform_7(%arg0: i32) -> (i32, i32) {
    %c0_i32 = arith.constant 0 : i32
    %c0_i32_0 = arith.constant 0 : i32
    return %c0_i32, %arg0 : i32, i32
  }
}

</mosaic_0001>

<bundles_post_ra>
// kernel: tpu_custom_call.1
= control target key start
LH: loop header
LB: loop body
LE: loop exit
PB: predicated region body
PF: predicated region fallthrough
CT: control target
= control target key end

     0   :  { %13 = vsyncpa [#allocation5], 0  ;;  %s1608_s0 = inlined_call_operand.hbm [shape: f32[32,768], index: 0, kind: input, shape index: {}]   ;;  %s1609_s1 = inlined_call_operand.vmem [shape: f32[8,32], index: 1, kind: input, shape index: {}]   ;;  %s1610_s2 = inlined_call_operand.vmem [shape: f32[8,1], index: 2, kind: input, shape index: {}]   ;;  %s1611_s3 = inlined_call_operand.vmem [shape: f32[8,8], index: 3, kind: input, shape index: {}]   ;;  %s1612_s4 = inlined_call_operand.vmem [shape: f32[32,8], index: 4, kind: input, shape index: {}]   ;;  %s1613_s5 = inlined_call_operand.vmem [shape: f32[8,1], index: 5, kind: input, shape index: {}]   ;;  %s1614_s6 = inlined_call_operand.hbm [shape: f32[32,768], index: 6, kind: output, shape index: {0}]   ;;  %s1615_s7 = inlined_call_operand.hbm [shape: f32[1,768], index: 7, kind: output, shape index: {1}]  }
   0x1   :  { %15 = vsyncpa [#allocation5 + $0x1], 0 }
   0x2   :  { %16 = vsyncpa [#allocation6], 0 }
   0x3   :  { %18 = vsyncpa [#allocation6 + $0x1], 0 }
   0x4   :  { %19 = vsyncpa [#allocation9], 0 }
   0x5   :  { %21 = vsyncpa [#allocation9 + $0x1], 0  ;;  %s1294_s24 = smov 0   ;;  %s1296_s25 = smov 0  }
   0x6   :  { %s1298_s26 = smov 0   ;;  %s1300_s27 = smov 0  }
   0x7 LB: > { %s1315_s28 = sadd.s32 4294967295, %s1234_s27   ;;  %s975_s29 = sadd.s32 4294967294, %s1234_s27   ;;  %s1234_s27 = sphi %s1300_s27, %s1630_s27   ;;  %s1230_s26 = sphi %s1298_s26, %s1629_s26   ;;  %s1226_s25 = sphi %s1296_s25, %s1628_s25   ;;  %s1222_s24 = sphi %s1294_s24, %s1627_s24  }
   0x8   : > { %s1319_s30 = sadd.s32 1, %s1234_s27   ;;  %s34_s8 = sadd.s32 1, %s1230_s26 }
   0x9   : > { %s31_s9 = ssub.s32 %s1234_s27, %s1319_s30  ;;  %p41_p0 = scmp.ne.s32.totalorder %s1230_s26, %s1226_s25 }
   0xa   : > { %p32_p1 = scmp.eq.s32.totalorder %s31_s9, 0  ;;  %p42_p2 = scmp.eq.s32.totalorder %s1234_s27, 0 }
   0xb   : > { %p47_p3 = scmp.ne.s32.totalorder %s1226_s25, %s1222_s24  ;;  %p48_p4 = scmp.eq.s32.totalorder %s1315_s28, 0 }
   0xc   : > { %s1331_s10 = scalar_select %p32_p1, %s1230_s26, %s34_s8  }
   0xd   : > { %p1333_p5 = por %p42_p2, %p41_p0  ;;  %p1337_p6 = por %p48_p4, %p47_p3 }
   0xe   : > { %p176_p7 = scmp.eq.s32.totalorder %s1315_s28, 2  ;;  %p182_p8 = scmp.eq.s32.totalorder %s975_s29, 2 }
   0xf   : > { %p1028_p9 = scmp.lt.s32.totalorder %s1234_s27, 3  ;;  %s243_s15 = sand.u32 1, %s1230_s26  }
  0x10   : > { %p1343_p10 = por %p176_p7, %p41_p0  ;;  %p1347_p11 = por %p182_p8, %p47_p3 }
  0x11   : > { %s1000_s16 = sshll.u32 %s1234_s27, 8  ;;  %s978_s17 = sshll.u32 %s243_s15, 6 }
  0x12   : > { %s1619_s13 = scalar_select %p1343_p10, 1, 0 }
  0x13   : > { %s1620_s14 = scalar_select %p1347_p11, 1, 0 }
  0x14   : > { %s1356_s20 = scalar_lea.hbm %s1608_s0, %s1000_s16  ;;  %s247_s21 = scalar_lea.vmem [#allocation4], %s978_s17 }
  0x15   : > { %s254_s22 = sshll.u32 %s247_s21, 4  ;;  %p1360_p12 = pnand %p1028_p9, %p1333_p5  ;;  %s1364_s22 = int_to_ptr.vmem [resolvable:$true] %s254_s22 }
  0x16   : > { %s1367_s29 = scalar_lea.sflag [#allocation5], %s243_s15  ;;  %s1106_s8 = scalar_lea.hbm %s1356_s20, 1024 }
  0x17   : > { %p1107_p0 = scmp.ne.s32.totalorder %s1356_s20, %s1106_s8  ;;  %p1108_p1 = pneg %p1360_p12 }
  0x18   : > { %s1111_s16 = scalar_lea.hbm %s1608_s0, 3072  ;;  %p1112_p4 = scmp.lt.u32.totalorder %s1356_s20, %s1608_s0 }
  0x19   : > { %p1109_p2 = pnand %p1108_p1, %p1107_p0  ;;  %p1113_p5 = scmp.lt.u32.totalorder %s1111_s16, %s1106_s8 }
  0x1a   : > { %p1115_p8 = scmp.lt.u32.totalorder %s1106_s8, %s1356_s20 }
  0x1b   : > { %p1110_p3 = pneg %p1109_p2  ;;  %p1114_p7 = por %p1113_p5, %p1112_p4 }
  0x1d   : > { %p1116_p9 = por %p1115_p8, %p1114_p7 }
  0x1f   : > { %p1117_p13 = pnand %p1116_p9, %p1110_p3 }
  0x21   : > { %1120 = shalt.err (!%p1117_p13)
}
  0x22   : > { %s1121_s15 = scalar_lea.vmem %s1364_s22, 1024  ;;  %s1236_s19 = smov [#allocation4]  }
  0x23   : > { %p1122_p0 = scmp.ne.s32.totalorder %s1364_s22, %s1121_s15  ;;  %s1126_s21 = sshll.u32 %s1236_s19, 4  ;;  %s1127_s21 = int_to_ptr.vmem [resolvable:$false] %s1126_s21 }
  0x24   : > { %s1128_s9 = scalar_lea.vmem %s1127_s21, 2048  ;;  %p1129_p10 = scmp.lt.s32.totalorder %s1364_s22, %s1127_s21 }
  0x25   : > { %p1124_p2 = pnand %p1122_p0, %p1108_p1  ;;  %p1130_p4 = scmp.lt.s32.totalorder %s1128_s9, %s1121_s15 }
  0x27   : > { %p1125_p11 = pneg %p1124_p2  ;;  %p1131_p5 = por %p1130_p4, %p1129_p10 }
  0x29   : > { %p1132_p7 = pnand %p1131_p5, %p1125_p11 }
  0x2b   : > { %1135 = shalt.err (!%p1132_p7)
}
  0x2c   : > { %s1237_s8 = smov 768   ;;  %s1238_s11 = smov 256  }
  0x2d   : > { %s1239_s16 = smov 16   ;;  %p262_p13 = scmp.lt.s32.totalorder %s1234_s27, 4 }
  0x2e   : > { %1020 = dma.hbm_to_vmem [thread:$0]  (!%p1360_p12), %s1356_s20, 1024, %s1364_s22, %s1367_s29, %s1237_s8, %s1238_s11, %s1239_s16  }
  0x2f   : > { %p1622_p1 = scmp.ge.s32.totalorder %s1234_s27, 1 }
  0x31   : > { %p263_p3 = pnand %p1622_p1, %p262_p13 }
  0x32   : > { %s1399_s17 = sand.u32 (!%p263_p3), 1, %s1226_s25  }
  0x33   : > { %266 = sbr.rel (%p263_p3) target bundleno = 770 (0x302), region = 44  ;;  %s982_s18 = sshll.u32 (!%p263_p3), %s1399_s17, 6 }
  0x34   : > { %s269_s15 = scalar_lea.sflag (!%p263_p3), [#allocation5], %s1399_s17  ;;  %s272_s19 = scalar_lea.vmem (!%p263_p3), [#allocation4], %s982_s18 }
  0x3a   : > { %1209 = dma.done.wait (%p1337_p6), %s269_s15, 1024  }
  0x3b   : > { %1211 = vsyncadd (%p1337_p6), %s269_s15, 4294966272  ;;  %v1240_v0 = vmov 0.0   ;;  %v1241_v1 = vmov 0   ;;  %v1242_v2 = vmov 1   ;;  %v1411_v3 = vld [vmem:[%s272_s19 + $0x8] sm:$0xff]  ;;  %v1413_v4 = vld [vmem:[%s272_s19 + $0x18] sm:$0xff]  ;;  %v405_v30 = vlaneseq }
  0x3c   : > { %394 = vmatprep.mubr.f32.mxu0 %v1240_v0  ;;  %1077 = vset.pattern.permute.xlu0 %v1241_v1  ;;  %v1415_v5 = vld [vmem:[%s272_s19] sm:$0xff]  ;;  %v1003_v6 = vpack.c.bf16 %v1413_v4, %v1411_v3  ;;  %v1419_v7 = vld [vmem:[%s272_s19 + $0x10] sm:$0xff]  ;;  %v1421_v8 = vld [vmem:[%s272_s19 + $0x28] sm:$0xff]  ;;  %vm326_vm0 = vcmask 261120   ;;  %v1243_v18 = vmov 2   ;;  %v1244_v19 = vmov 3  }
  0x3d   : > { %1078 = vset.pattern.permute.xlu1 %v1242_v2  ;;  %711 = vmatprep.mubr.f32.mxu1 %v1240_v0  ;;  %v1423_v9 = vld [vmem:[%s272_s19 + $0x38] sm:$0xff]  ;;  %v1005_v10 = vpack.c.bf16 %v1419_v7, %v1415_v5  ;;  %v1429_v12 = vld [vmem:[%s272_s19 + $0x20] sm:$0xff]  ;;  %v1431_v13 = vld [vmem:[%s272_s19 + $0x30] sm:$0xff]  ;;  %v1245_v20 = vmov 4   ;;  %v1246_v21 = vmov 5   ;;  %v1247_v22 = vmov 6  }
  0x3e   : > { %v1007_v11 = vpack.c.bf16 %v1423_v9, %v1421_v8  ;;  %1004 = vmatprep.subr.bf16.mxu0 %v1003_v6  ;;  %v320_v14 = vld [vmem:[%s1610_s2] sm:$0xff]  ;;  %v1009_v15 = vpack.c.bf16 %v1431_v13, %v1429_v12  ;;  %v1447_v31 = vshrl.u32 %v405_v30, 7  ;;  %vm1455_vm1 = vcmp.lt.s32.totalorder %v405_v30, 256  ;;  %s1508_s29 = scalar_lea.vmem [#allocation7], %s982_s18  ;;  %s1001_s21 = sshll.u32 %s1315_s28, 8 }
  0x3f   : > { %1006 = vmatpush1.bf16.msra.mxu0 %v1005_v10  ;;  %323 = vperm.xlu0 %1077, %v320_v14   ;;  %v413_v16 = vld [vmem:[%s1611_s3] sm:$0xff]  ;;  %vm634_vm2 = vcmask 64512   ;;  %s856_s18 = sshll.u32 %s1508_s29, 4  ;;  %s1528_s11 = scalar_lea.hbm %s1614_s6, %s1001_s21  ;;  %s1521_s18 = int_to_ptr.vmem [resolvable:$true] %s856_s18 }
  0x40   : > { %1008 = vmatprep.subr.bf16.mxu0 %v1007_v11  ;;  %447 = vperm.xlu1 %1078, %v413_v16   ;;  %v319_v17 = vld [vmem:[%s1609_s1] sm:$0xff]  ;;  %v1450_v32 = vsub.s32 1, %v1447_v31  ;;  %v1453_v33 = vsub.s32 0, %v1447_v31  ;;  %s838_s16 = scalar_lea.sflag [#allocation6], %s1399_s17  ;;  %s1136_s15 = scalar_lea.vmem %s1521_s18, 1024 }
  0x41   : > { %v748_v23 = vld [vmem:[%s1613_s5] sm:$0xff]  ;;  %p1137_p6 = scmp.ne.s32.totalorder %s1521_s18, %s1136_s15  ;;  %p1625_p10 = scmp.ne.s32.totalorder %s1619_s13, 0 }
  0x42   : > { %s1248_s19 = smov [#allocation7]  }
  0x43   : > { %1010 = vmatpush1.bf16.msra.mxu0 %v1009_v15  ;;  %416 = vperm.xlu0 %1077, %v413_v16   ;;  %p1138_p11 = pnand %p1137_p6, %p1625_p10  ;;  %s1140_s12 = sshll.u32 %s1248_s19, 4  ;;  %s1141_s12 = int_to_ptr.vmem [resolvable:$false] %s1140_s12 }
  0x44   : > { %1079 = vset.pattern.permute.xlu1 %v1243_v18  ;;  %s1142_s20 = scalar_lea.vmem %s1141_s12, 2048  ;;  %p1143_p8 = scmp.lt.s32.totalorder %s1521_s18, %s1141_s12 }
  0x45   : > { %478 = vperm.xlu1 %1079, %v413_v16   ;;  %p1139_p12 = pneg %p1138_p11  ;;  %p1144_p9 = scmp.lt.s32.totalorder %s1142_s20, %s1136_s15 }
  0x46   : > { %985 = vmatmul.mubr.msk.f32.vlgmr.msra.gmra.mrb[0].mxu0 %vm326_vm0, %v319_v17 }
  0x47   : > { %1080 = vset.pattern.permute.xlu0 %v1244_v19  ;;  %p1145_p0 = por %p1144_p9, %p1143_p8 }
  0x48   : > { %509 = vperm.xlu0 %1080, %v413_v16  }
  0x49   : > { %1081 = vset.pattern.permute.xlu1 %v1245_v20  ;;  %p1146_p2 = pnand %p1145_p0, %p1139_p12 }
  0x4a   : > { %540 = vperm.xlu1 %1081, %v413_v16  }
  0x4c   : > { %1083 = vset.pattern.permute.xlu0 %v1247_v22 }
  0x4d   : > { %602 = vperm.xlu0 %1083, %v413_v16  }
  0x4e   : > { %1082 = vset.pattern.permute.xlu1 %v1246_v21 }
  0x4f   : > { %571 = vperm.xlu1 %1082, %v413_v16  }
  0x51   : > { %1085 = vset.pattern.permute.xlu0 %v1241_v1 }
  0x53   : > { %1084 = vset.pattern.permute.xlu1 %v1241_v1 }
  0x54   : > { %751 = vperm.xlu1 %1084, %v748_v23  }
  0xbe   : > { %v324_v24 = vpop.permute.xlu0 %323 }
  0xbf   : > { %v448_v45 = vpop.permute.xlu1 %447 }
  0xc2   : > { %v417_v38 = vpop.permute.xlu0 %416 }
  0xc4   : > { %v479_v54 = vpop.permute.xlu1 %478 }
  0xc7   : > { %v510_v63 = vpop.permute.xlu0 %509 }
  0xc9   : > { %v541_v17 = vpop.permute.xlu1 %540 }
 0x119   : > { %v396_v25 = vpop.f32.mrb[0].mxu0 }
 0x11a   : > { %v397_v26 = vadd.f32 %v396_v25, %v324_v24  ;;  %v398_v27 = vpop.f32.mrb[1].mxu0 }
 0x11b   : > { %v399_v28 = vadd.f32 %v398_v27, %v324_v24 }
 0x11c   : > { %401 = vst [vmem:[#allocation2] sm:$0xff] %v397_v26 }
 0x11d   : > { %402 = vst [vmem:[#allocation2 + $0x8] sm:$0xff] %v399_v28 }
 0x124   : > { %v403_v29 = vld [vmem:[#allocation2] ss:$8 sm:$0x3] }
 0x125   : > { %1086 = vtanh.f32 %v403_v29 }
 0x12f   : > { %v1087_v35 = vpop.eup %1086 }
 0x130   : > { %v427_v36 = vrot.slane %v1087_v35, %v1450_v32  ;;  %v423_v37 = vrot.slane %v1087_v35, %v1453_v33  ;;  %409 = vst.msk [vmem:[#allocation3] ss:$8 sm:$0x3] %vm1455_vm1, %v1087_v35 }
 0x132   : > { %v431_v39 = vmul.f32 %v427_v36, %v417_v38  ;;  %v430_v40 = vmul.f32 %v423_v37, %v417_v38 }
 0x134   : > { %v433_v41 = vadd.f32 %v431_v39, %v399_v28  ;;  %v432_v42 = vadd.f32 %v430_v40, %v397_v26  ;;  %v572_v26 = vpop.permute.xlu1 %571  ;;  %v603_v39 = vpop.permute.xlu0 %602 }
 0x136   : > { %435 = vst [vmem:[#allocation2 + $0x8] sm:$0xff] %v433_v41  ;;  %434 = vst [vmem:[#allocation2] sm:$0xff] %v432_v42 }
 0x13d   : > { %v437_v43 = vld [vmem:[#allocation2 + $0x1] ss:$8 sm:$0x3] }
 0x13e   : > { %1088 = vtanh.f32 %v437_v43 }
 0x148   : > { %v1089_v44 = vpop.eup %1088 }
 0x149   : > { %v454_v46 = vrot.slane %v1089_v44, %v1453_v33  ;;  %v458_v47 = vrot.slane %v1089_v44, %v1450_v32  ;;  %440 = vst.msk [vmem:[#allocation3 + $0x1] ss:$8 sm:$0x3] %vm1455_vm1, %v1089_v44 }
 0x14b   : > { %v461_v48 = vmul.f32 %v454_v46, %v448_v45  ;;  %v462_v49 = vmul.f32 %v458_v47, %v448_v45 }
 0x14d   : > { %v463_v50 = vadd.f32 %v461_v48, %v432_v42  ;;  %v464_v51 = vadd.f32 %v462_v49, %v433_v41 }
 0x14f   : > { %465 = vst [vmem:[#allocation2] sm:$0xff] %v463_v50  ;;  %466 = vst [vmem:[#allocation2 + $0x8] sm:$0xff] %v464_v51 }
 0x156   : > { %v468_v52 = vld [vmem:[#allocation2 + $0x2] ss:$8 sm:$0x3] }
 0x157   : > { %1090 = vtanh.f32 %v468_v52 }
 0x161   : > { %v1091_v53 = vpop.eup %1090 }
 0x162   : > { %v485_v55 = vrot.slane %v1091_v53, %v1453_v33  ;;  %v489_v56 = vrot.slane %v1091_v53, %v1450_v32  ;;  %471 = vst.msk [vmem:[#allocation3 + $0x2] ss:$8 sm:$0x3] %vm1455_vm1, %v1091_v53 }
 0x164   : > { %v492_v57 = vmul.f32 %v485_v55, %v479_v54  ;;  %v493_v58 = vmul.f32 %v489_v56, %v479_v54  ;;  %v752_v56 = vpop.permute.xlu1 %751 }
 0x166   : > { %v494_v59 = vadd.f32 %v492_v57, %v463_v50  ;;  %v495_v60 = vadd.f32 %v493_v58, %v464_v51  ;;  %v632_v50 = vld [vmem:[%s1612_s4 + $0x10] sm:$0xff]  ;;  %v633_v51 = vld [vmem:[%s1612_s4 + $0x18] sm:$0xff] }
 0x168   : > { %496 = vst [vmem:[#allocation2] sm:$0xff] %v494_v59  ;;  %497 = vst [vmem:[#allocation2 + $0x8] sm:$0xff] %v495_v60 }
 0x16f   : > { %v499_v61 = vld [vmem:[#allocation2 + $0x3] ss:$8 sm:$0x3] }
 0x170   : > { %1092 = vtanh.f32 %v499_v61 }
 0x17a   : > { %v1093_v62 = vpop.eup %1092 }
 0x17b   : > { %v516_v1 = vrot.slane %v1093_v62, %v1453_v33  ;;  %v520_v2 = vrot.slane %v1093_v62, %v1450_v32  ;;  %502 = vst.msk [vmem:[#allocation3 + $0x3] ss:$8 sm:$0x3] %vm1455_vm1, %v1093_v62 }
 0x17d   : > { %v523_v6 = vmul.f32 %v516_v1, %v510_v63  ;;  %v524_v10 = vmul.f32 %v520_v2, %v510_v63 }
 0x17f   : > { %v525_v11 = vadd.f32 %v523_v6, %v494_v59  ;;  %v526_v14 = vadd.f32 %v524_v10, %v495_v60 }
 0x181   : > { %527 = vst [vmem:[#allocation2] sm:$0xff] %v525_v11  ;;  %528 = vst [vmem:[#allocation2 + $0x8] sm:$0xff] %v526_v14 }
 0x188   : > { %v530_v15 = vld [vmem:[#allocation2 + $0x4] ss:$8 sm:$0x3] }
 0x189   : > { %1094 = vtanh.f32 %v530_v15 }
 0x193   : > { %v1095_v16 = vpop.eup %1094 }
 0x194   : > { %v547_v18 = vrot.slane %v1095_v16, %v1453_v33  ;;  %v551_v19 = vrot.slane %v1095_v16, %v1450_v32  ;;  %533 = vst.msk [vmem:[#allocation3 + $0x4] ss:$8 sm:$0x3] %vm1455_vm1, %v1095_v16 }
 0x196   : > { %v554_v20 = vmul.f32 %v547_v18, %v541_v17  ;;  %v555_v21 = vmul.f32 %v551_v19, %v541_v17 }
 0x198   : > { %v556_v22 = vadd.f32 %v554_v20, %v525_v11  ;;  %v557_v23 = vadd.f32 %v555_v21, %v526_v14 }
 0x19a   : > { %558 = vst [vmem:[#allocation2] sm:$0xff] %v556_v22  ;;  %559 = vst [vmem:[#allocation2 + $0x8] sm:$0xff] %v557_v23 }
 0x1a1   : > { %v561_v24 = vld [vmem:[#allocation2 + $0x5] ss:$8 sm:$0x3] }
 0x1a2   : > { %1096 = vtanh.f32 %v561_v24 }
 0x1ac   : > { %v1097_v25 = vpop.eup %1096 }
 0x1ad   : > { %v578_v27 = vrot.slane %v1097_v25, %v1453_v33  ;;  %v582_v28 = vrot.slane %v1097_v25, %v1450_v32  ;;  %564 = vst.msk [vmem:[#allocation3 + $0x5] ss:$8 sm:$0x3] %vm1455_vm1, %v1097_v25 }
 0x1af   : > { %v585_v29 = vmul.f32 %v578_v27, %v572_v26  ;;  %v586_v30 = vmul.f32 %v582_v28, %v572_v26 }
 0x1b1   : > { %v587_v35 = vadd.f32 %v585_v29, %v556_v22  ;;  %v588_v36 = vadd.f32 %v586_v30, %v557_v23 }
 0x1b3   : > { %589 = vst [vmem:[#allocation2] sm:$0xff] %v587_v35  ;;  %590 = vst [vmem:[#allocation2 + $0x8] sm:$0xff] %v588_v36 }
 0x1ba   : > { %v592_v37 = vld [vmem:[#allocation2 + $0x6] ss:$8 sm:$0x3] }
 0x1bb   : > { %1098 = vtanh.f32 %v592_v37 }
 0x1c5   : > { %v1099_v38 = vpop.eup %1098 }
 0x1c6   : > { %v609_v40 = vrot.slane %v1099_v38, %v1453_v33  ;;  %v613_v41 = vrot.slane %v1099_v38, %v1450_v32  ;;  %595 = vst.msk [vmem:[#allocation3 + $0x6] ss:$8 sm:$0x3] %vm1455_vm1, %v1099_v38  ;;  %v630_v32 = vld [vmem:[%s1612_s4] sm:$0xff]  ;;  %v631_v33 = vld [vmem:[%s1612_s4 + $0x8] sm:$0xff] }
 0x1c8   : > { %v616_v42 = vmul.f32 %v609_v40, %v603_v39  ;;  %v617_v43 = vmul.f32 %v613_v41, %v603_v39 }
 0x1ca   : > { %v618_v44 = vadd.f32 %v616_v42, %v587_v35  ;;  %v619_v45 = vadd.f32 %v617_v43, %v588_v36 }
 0x1cc   : > { %620 = vst [vmem:[#allocation2] sm:$0xff] %v618_v44  ;;  %621 = vst [vmem:[#allocation2 + $0x8] sm:$0xff] %v619_v45 }
 0x1d3   : > { %v623_v46 = vld [vmem:[#allocation2 + $0x7] ss:$8 sm:$0x3] }
 0x1d4   : > { %1100 = vtanh.f32 %v623_v46 }
 0x1de   : > { %v1101_v47 = vpop.eup %1100 }
 0x1df   : > { %626 = vst.msk [vmem:[#allocation3 + $0x7] ss:$8 sm:$0x3] %vm1455_vm1, %v1101_v47 }
 0x1e6   : > { %v629_v48 = vld [vmem:[#allocation3 + $0x8] sm:$0xff]  ;;  %v628_v49 = vld [vmem:[#allocation3] sm:$0xff] }
 0x1e7   : > { %647 = vmatprep.subr.mxu1 %v629_v48  ;;  %v744_v52 = vmul.f32 %v628_v49, %v628_v49  ;;  %v745_v53 = vmul.f32 %v629_v48, %v629_v48 }
 0x1e8   : > { %648 = vmatpush1.msra.mxu1 %v628_v49 }
 0x1e9   : > { %986 = vmatmul.mubr.msk.f32.vlgmr.msra.gmra.mrb[0].mxu1 %vm634_vm2, %v630_v32  ;;  %v746_v54 = vsub.f32 1.0, %v744_v52  ;;  %v747_v55 = vsub.f32 1.0, %v745_v53 }
 0x1ea   : > { %717 = vmatprep.mubr.f32.mxu1 %v1240_v0 }
 0x1eb   : > { %v754_v57 = vmul.f32 %v752_v56, %v746_v54  ;;  %v755_v58 = vmul.f32 %v752_v56, %v747_v55 }
 0x1ed   : > { %987 = vmatmul.mubr.msk.f32.gmra.mrb[2].mxu1 %vm634_vm2, %v631_v33  ;;  %v756_v59 = vadd.f32 1.0, %v754_v57  ;;  %v757_v60 = vadd.f32 1.0, %v755_v58 }
 0x1ee   : > { %723 = vmatprep.mubr.f32.mxu1 %v1240_v0 }
 0x1ef   : > { %v758_v61 = vand.u32 2147483647, %v756_v59  ;;  %v759_v62 = vand.u32 2147483647, %v757_v60 }
 0x1f1   : > { %988 = vmatmul.mubr.msk.f32.gmra.mrb[4].mxu1 %vm634_vm2, %v632_v50  ;;  %v760_v63 = vadd.f32 1e-08, %v758_v61  ;;  %v761_v1 = vadd.f32 1e-08, %v759_v62 }
 0x1f2   : > { %729 = vmatprep.mubr.f32.mxu1 %v1240_v0 }
 0x1f3   : > { %1102 = vlog2.f32 %v760_v63 }
 0x1f4   : > { %1104 = vlog2.f32 %v761_v1 }
 0x1f5   : > { %989 = vmatmul.mubr.msk.f32.gmra.mrb[6].mxu1 %vm634_vm2, %v633_v51 }
 0x1fd   : > { %v1103_v16 = vpop.eup %1102 }
 0x1fe   : > { %v1105_v17 = vpop.eup %1104  ;;  %v763_v22 = vmul.f32 0.6931472, %v1103_v16 }
 0x1ff   : > { %v765_v25 = vmul.f32 0.6931472, %v1105_v17 }
 0x200   : > { %v766_v30 = vrot.slane %v763_v22, 4 }
 0x202   : > { %v767_v41 = vadd.f32 %v766_v30, %v763_v22 }
 0x2bc   : > { %v713_v0 = vpop.f32.mrb[0].mxu1 }
 0x2bd   : > { %v736_v2 = vadd.f32 %v713_v0, %v1415_v5  ;;  %v715_v6 = vpop.f32.mrb[1].mxu1 }
 0x2be   : > { %v737_v10 = vadd.f32 %v715_v6, %v1411_v3 }
 0x2bf   : > { %808 = vst [vmem:[%s1508_s29] sm:$0xff] %v736_v2  ;;  %v778_v3 = vmul.f32 %v736_v2, %v736_v2 }
 0x2c0   : > { %809 = vst [vmem:[%s1508_s29 + $0x8] sm:$0xff] %v737_v10  ;;  %v719_v11 = vpop.f32.mrb[2].mxu1  ;;  %v779_v19 = vmul.f32 %v737_v10, %v737_v10 }
 0x2c1   : > { %v738_v14 = vadd.f32 %v719_v11, %v1419_v7  ;;  %v721_v15 = vpop.f32.mrb[3].mxu1 }
 0x2c2   : > { %v739_v5 = vadd.f32 %v721_v15, %v1413_v4 }
 0x2c3   : > { %v780_v18 = vmul.f32 %v738_v14, %v738_v14  ;;  %810 = vst [vmem:[%s1508_s29 + $0x10] sm:$0xff] %v738_v14 }
 0x2c4   : > { %v781_v20 = vmul.f32 %v739_v5, %v739_v5  ;;  %811 = vst [vmem:[%s1508_s29 + $0x18] sm:$0xff] %v739_v5  ;;  %v725_v21 = vpop.f32.mrb[4].mxu1 }
 0x2c5   : > { %v786_v23 = vadd.f32 %v780_v18, %v778_v3  ;;  %v740_v7 = vadd.f32 %v725_v21, %v1429_v12  ;;  %v727_v24 = vpop.f32.mrb[5].mxu1 }
 0x2c6   : > { %v795_v26 = vadd.f32 %v781_v20, %v779_v19  ;;  %v741_v4 = vadd.f32 %v727_v24, %v1421_v8  ;;  %v772_v8 = vrot.slane %v765_v25, 4 }
 0x2c7   : > { %v782_v27 = vmul.f32 %v740_v7, %v740_v7  ;;  %812 = vst [vmem:[%s1508_s29 + $0x20] sm:$0xff] %v740_v7 }
 0x2c8   : > { %v783_v28 = vmul.f32 %v741_v4, %v741_v4  ;;  %813 = vst [vmem:[%s1508_s29 + $0x28] sm:$0xff] %v741_v4  ;;  %v731_v29 = vpop.f32.mrb[6].mxu1 }
 0x2c9   : > { %v787_v12 = vadd.f32 %v786_v23, %v782_v27  ;;  %v742_v35 = vadd.f32 %v731_v29, %v1431_v13  ;;  %v733_v36 = vpop.f32.mrb[7].mxu1 }
 0x2ca   : > { %v796_v37 = vadd.f32 %v795_v26, %v783_v28  ;;  %v743_v38 = vadd.f32 %v733_v36, %v1423_v9 }
 0x2cb   : > { %v784_v39 = vmul.f32 %v742_v35, %v742_v35  ;;  %814 = vst [vmem:[%s1508_s29 + $0x30] sm:$0xff] %v742_v35 }
 0x2cc   : > { %v785_v40 = vmul.f32 %v743_v38, %v743_v38  ;;  %815 = vst [vmem:[%s1508_s29 + $0x38] sm:$0xff] %v743_v38 }
 0x2cd   : > { %v788_v42 = vadd.f32 %v787_v12, %v784_v39 }
 0x2ce   : > { %1149 = shalt.err (!%p1146_p2)
}
 0x2cf   : > { %s1150_s22 = scalar_lea.hbm %s1528_s11, 1024  ;;  %s1154_s21 = scalar_lea.hbm %s1614_s6, 3072 }
 0x2d0   : > { %p1151_p4 = scmp.ne.s32.totalorder %s1528_s11, %s1150_s22  ;;  %p1155_p13 = scmp.lt.u32.totalorder %s1528_s11, %s1614_s6 }
 0x2d1   : > { %p1156_p1 = scmp.lt.u32.totalorder %s1154_s21, %s1150_s22  ;;  %p1158_p6 = scmp.lt.u32.totalorder %s1150_s22, %s1528_s11 }
 0x2d2   : > { %p1152_p5 = pnand %p1151_p4, %p1625_p10 }
 0x2d3   : > { %p1157_p3 = por %p1156_p1, %p1155_p13 }
 0x2d4   : > { %p1153_p7 = pneg %p1152_p5 }
 0x2d5   : > { %p1159_p11 = por %p1158_p6, %p1157_p3 }
 0x2d7   : > { %p1160_p12 = pnand %p1159_p11, %p1153_p7 }
 0x2d9   : > { %1163 = shalt.err (!%p1160_p12)
}
 0x2da   : > { %s1249_s15 = smov 256   ;;  %s1250_s19 = smov 768   ;;  %v773_v9 = vadd.f32 %v772_v8, %v765_v25  ;;  %v797_v13 = vadd.f32 %v796_v37, %v785_v40  ;;  %v789_v43 = vrot.slane %v788_v42, 4  ;;  %v768_v45 = vrot.slane %v767_v41, 2 }
 0x2db   : > { %s1251_s12 = smov 16   ;;  %v1252_v55 = vmov 1966171168   ;;  %s843_s21 = scalar_lea.sflag [#allocation9], %s1399_s17 }
 0x2dc   : > { %1013 = dma.vmem_to_hbm [thread:$0]  (%p1625_p10), %s1521_s18, 1024, %s1528_s11, %s838_s16, %s1249_s15, %s1250_s19, %s1251_s12   ;;  %v798_v44 = vrot.slane %v797_v13, 4  ;;  %v790_v46 = vadd.f32 %v789_v43, %v788_v42  ;;  %v774_v47 = vrot.slane %v773_v9, 2  ;;  %v769_v33 = vadd.f32 %v768_v45, %v767_v41 }
 0x2dd   : > { %v822_v56 = vunpack.c.l.s4 %v1252_v55  ;;  %s984_s18 = sshll.u32 %s1399_s17, 1  ;;  %s1002_s11 = sshll.u32 %s1315_s28, 5 }
 0x2de   : > { %v799_v48 = vadd.f32 %v798_v44, %v797_v13  ;;  %v791_v49 = vrot.slane %v790_v46, 2  ;;  %v775_v51 = vadd.f32 %v774_v47, %v773_v9  ;;  %v770_v57 = vrot.slane %v769_v33, 1  ;;  %s307_s16 = scalar_lea.vmem [#allocation8], %s984_s18  ;;  %s1563_s29 = scalar_lea.hbm %s1615_s7, %s1002_s11 }
 0x2df   : > { %v823_v63 = vunpack.c.0.s8 %v822_v56  ;;  %s873_s20 = sshll.u32 %s307_s16, 4  ;;  %s1253_s28 = smov [#allocation8]   ;;  %s1565_s20 = int_to_ptr.vmem [resolvable:$true] %s873_s20 }
 0x2e0   : > { %v800_v32 = vrot.slane %v799_v48, 2  ;;  %v792_v50 = vadd.f32 %v791_v49, %v790_v46  ;;  %v776_v59 = vrot.slane %v775_v51, 1  ;;  %v771_v1 = vadd.f32 %v770_v57, %v769_v33  ;;  %s1164_s9 = scalar_lea.vmem %s1565_s20, 32  ;;  %s1168_s8 = sshll.u32 %s1253_s28, 4  ;;  %s1169_s8 = int_to_ptr.vmem [resolvable:$false] %s1168_s8 }
 0x2e1   : > { %v826_v14 = vsub.s32 %v823_v63, %v1447_v31  ;;  %p1165_p8 = scmp.ne.s32.totalorder %s1565_s20, %s1164_s9  ;;  %s1170_s15 = scalar_lea.vmem %s1169_s8, 64 }
 0x2e2   : > { %v801_v52 = vadd.f32 %v800_v32, %v799_v48  ;;  %v793_v53 = vrot.slane %v792_v50, 1  ;;  %v777_v2 = vadd.f32 %v776_v59, %v775_v51  ;;  %p1171_p2 = scmp.lt.s32.totalorder %s1565_s20, %s1169_s8  ;;  %p1172_p4 = scmp.lt.s32.totalorder %s1170_s15, %s1164_s9 }
 0x2e3   : > { %p1166_p9 = pnand %p1165_p8, %p1625_p10 }
 0x2e4   : > { %v802_v54 = vrot.slane %v801_v52, 1  ;;  %v794_v58 = vadd.f32 %v793_v53, %v792_v50  ;;  %p1173_p5 = por %p1172_p4, %p1171_p2 }
 0x2e5   : > { %p1167_p0 = pneg %p1166_p9 }
 0x2e6   : > { %v803_v60 = vadd.f32 %v802_v54, %v801_v52  ;;  %v804_v61 = vmul.f32 -0.5, %v794_v58 }
 0x2e7   : > { %p1174_p7 = pnand %p1173_p5, %p1167_p0 }
 0x2e8   : > { %v805_v62 = vmul.f32 -0.5, %v803_v60  ;;  %v990_v0 = vadd.f32 -29.406033, %v804_v61 }
 0x2ea   : > { %v991_v6 = vadd.f32 -29.406033, %v805_v62  ;;  %v816_v10 = vadd.f32 %v990_v0, %v771_v1 }
 0x2ec   : > { %v817_v11 = vadd.f32 %v991_v6, %v777_v2 }
 0x2ee   : > { %v820_v15 = vcombine.low %v816_v10, %v817_v11 }
 0x2f0   : > { %v827_v16 = vrot.slane %v820_v15, %v826_v14 }
 0x2f2   : > { %v834_v5 = vrot.slane %v827_v16, %v826_v14 }
 0x2f4   : > { %836 = vst.msk [vmem:[%s307_s16] sm:$0x3] %vm1455_vm1, %v834_v5 }
 0x2f5   : > { %1177 = shalt.err (!%p1174_p7)
}
 0x2f6   : > { %s1178_s17 = scalar_lea.hbm %s1563_s29, 32  ;;  %s1182_s18 = scalar_lea.hbm %s1615_s7, 96 }
 0x2f7   : > { %p1179_p13 = scmp.ne.s32.totalorder %s1563_s29, %s1178_s17  ;;  %p1183_p6 = scmp.lt.u32.totalorder %s1563_s29, %s1615_s7 }
 0x2f8   : > { %p1184_p11 = scmp.lt.u32.totalorder %s1182_s18, %s1178_s17  ;;  %p1186_p8 = scmp.lt.u32.totalorder %s1178_s17, %s1563_s29 }
 0x2f9   : > { %p1180_p1 = pnand %p1179_p13, %p1625_p10 }
 0x2fa   : > { %p1185_p12 = por %p1184_p11, %p1183_p6 }
 0x2fb   : > { %p1181_p3 = pneg %p1180_p1 }
 0x2fc   : > { %p1187_p9 = por %p1186_p8, %p1185_p12 }
 0x2fe   : > { %p1188_p0 = pnand %p1187_p9, %p1181_p3 }
 0x300   : > { %1191 = shalt.err (!%p1188_p0)
}
 0x301   : > { %1014 = dma.vmem_to_hbm [thread:$0]  (%p1625_p10), %s1565_s20, 32, %s1563_s29, %s843_s21  }
 0x302 PF: > { %p1029_p2 = scmp.ge.s32.totalorder %s1234_s27, 2  ;;  %s885_s22 = sand.u32 1, %s1222_s24  }
 0x303   : > { %p1626_p4 = scmp.ne.s32.totalorder %s1620_s14, 0  ;;  %s886_s23 = scalar_lea.sflag [#allocation6], %s885_s22 }
 0x305   : > { %p1022_p5 = pnand %p1029_p2, %p1626_p4 }
 0x307   : > { %1213 = dma.done.wait (!%p1022_p5), %s886_s23, 1024  }
 0x308   : > { %1215 = vsyncadd (!%p1022_p5), %s886_s23, 4294966272  ;;  %s895_s9 = scalar_lea.sflag [#allocation9], %s885_s22 }
 0x309   : > { %1217 = dma.done.wait (!%p1022_p5), %s895_s9, 32  }
 0x30a   : > { %1219 = vsyncadd (!%p1022_p5), %s895_s9, 4294967264  ;;  %p24_p10 = scmp.ge.s32.totalorder %s1319_s30, 5   ;;  %s1627_s24 = smov %s1226_s25 }
 0x30b   : > { %s1628_s25 = smov %s1230_s26  ;;  %s1629_s26 = smov %s1331_s10 }
 0x30c   : > { %s1630_s27 = smov %s1319_s30  ;;  %26 = sbr.rel (!%p24_p10) target bundleno = 7 (0x7), region = 120 }
 0x313   :  { %900 = vsyncpa [#allocation5], 1 }
 0x314   :  { %902 = vsyncpa [#allocation5 + $0x1], 1 }
 0x315   :  { %903 = vsyncpa [#allocation6], 1 }
 0x316   :  { %905 = vsyncpa [#allocation6 + $0x1], 1 }
 0x317   :  { %906 = vsyncpa [#allocation9], 1 }
 0x318   :  { %908 = vsyncpa [#allocation9 + $0x1], 1 }

</bundles_post_ra>
